<compile_context>
chip_gen: v6e
topology: v6e:2x2x1
jax: 0.10.0
libtpu: 0.0.40
codegen_flags: <defaults>
</compile_context>

<pallas_src>
import functools

import jax
import jax.numpy as jnp
from jax.experimental import pallas as pl
from jax.experimental.pallas import tpu as pltpu


def _compute_zero_padding(kernel_size):
    computed = tuple((k - 1) // 2 for k in kernel_size)
    return computed[0], computed[1]


def _sort2(vals, i, j):
    """Compare-exchange: afterwards vals[i] <= vals[j] (elementwise)."""
    a, b = vals[i], vals[j]
    vals[i] = jnp.minimum(a, b)
    vals[j] = jnp.maximum(a, b)


# Classic 19-comparator median-of-9 network (Paeth / Devillard).  Unused
# min/max outputs are dead code and eliminated by the compiler, so the number
# of live plane-sized temporaries shrinks as the network progresses.
_MEDIAN9_NETWORK = (
    (1, 2), (4, 5), (7, 8), (0, 1), (3, 4), (6, 7), (1, 2), (4, 5), (7, 8),
    (0, 3), (5, 8), (4, 7), (3, 6), (1, 4), (2, 5), (4, 7), (4, 2), (6, 4),
    (4, 2),
)


def _median_of(vals):
    """Elementwise (lower) median of a list of equally-shaped arrays."""
    n = len(vals)
    vals = list(vals)
    if n == 1:
        return vals[0]
    if n == 9:
        for i, j in _MEDIAN9_NETWORK:
            _sort2(vals, i, j)
        return vals[4]
    # General fallback: odd-even transposition sort, take the lower median
    # (matches torch.median semantics); DCE prunes exchanges whose outputs
    # never reach index (n-1)//2.
    for p in range(n):
        for i in range(p % 2, n - 1, 2):
            _sort2(vals, i, i + 1)
    return vals[(n - 1) // 2]


def _median_kernel(jmod_ref, x_ref, o_ref, pad_ref, *, kh, kw, ph, pw, h, w,
                   base):
    # jmod_ref: (1, h*w)  int32, column index (o mod w) per flat position
    # x_ref   : (TB, h*w) input planes, flattened (lane-dense)
    # o_ref   : (TB, h*w) output planes ("same"-size; wrapper crops if needed)
    # pad_ref : (TB, L)   flat zero-bordered staging scratch (VMEM)
    tb, L = pad_ref.shape
    dt = pad_ref.dtype
    hw = h * w

    # Fused zero padding: refresh the (small) zero prefix/suffix every step
    # (keeps the per-core scratch correct when the "parallel" axis is split
    # across TensorCores), then write the tile at the lane-aligned interior.
    if base > 0:
        pad_ref[:, :base] = jnp.zeros((tb, base), dt)
    if L - base - hw > 0:
        pad_ref[:, base + hw:] = jnp.zeros((tb, L - base - hw), dt)
    pad_ref[:, base:base + hw] = x_ref[...]

    col = jmod_ref[...]                      # (1, hw) output column index j
    zero = jnp.zeros((), dt)

    # One lane-validity mask per horizontal tap offset dj != pw; only one
    # bound can bind for each dj, and the mask is shared across all kh rows.
    masks = {}
    for dj in range(kw):
        if dj < pw:
            masks[dj] = col >= (pw - dj)
        elif dj > pw:
            masks[dj] = col < (w + pw - dj)

    # kh*kw shifted neighborhood taps: contiguous flat slices of the padded
    # buffer.  Vertical out-of-image taps read the zero prefix/suffix;
    # horizontal out-of-image taps are zeroed by the column masks.
    vals = []
    for di in range(kh):
        row_start = base + (di - ph) * w
        for dj in range(kw):
            s = row_start + (dj - pw)
            tap = pad_ref[:, s:s + hw]
            if dj != pw:
                tap = jnp.where(masks[dj], tap, zero)
            vals.append(tap)

    o_ref[...] = _median_of(vals).astype(o_ref.dtype)


def _choose_plane_block(bc, per_plane_bytes, target_bytes=8 << 20):
    """Pick the plane-block size TB.

    Candidates keep the block's second-minor dim either a multiple of 8 or
    equal to the full dim (layout-friendly).  Prefer the largest candidate
    whose per-step working set fits the budget, and >= 2 grid steps when
    possible so the "parallel" axis can be sharded across TensorCores.
    """
    cands = {bc} | {d for d in range(8, bc + 1, 8) if bc % d == 0}
    fitting = [d for d in sorted(cands) if d * per_plane_bytes <= target_bytes]
    if not fitting:
        fitting = [min(cands)]
    multi = [d for d in fitting if bc // d >= 2]
    return max(multi) if multi else max(fitting)


def median_blur(x, kernel_size=(3, 3)):
    """Pallas equivalent of kornia MedianBlur(kernel_size).forward(x)."""
    b, c, h, w = x.shape
    kh, kw = kernel_size
    ph, pw = _compute_zero_padding(kernel_size)

    # F.conv2d output spatial size with stride=1, padding=(ph, pw):
    out_h = h + 2 * ph - kh + 1
    out_w = w + 2 * pw - kw + 1

    bc = b * c
    hw = h * w
    xf = x.reshape(bc, hw)

    # Flat padded-buffer geometry: the image interior starts at the
    # lane-aligned offset `base`; zeros before/after provide the vertical
    # (row) padding.  `tail` covers the largest positive tap offset.
    base = -(-(ph * w + pw) // 128) * 128
    tail = (kh - 1 - ph) * w + (kw - 1 - pw)
    L = base + hw + tail

    # Column index (o mod w) per flattened position; precomputed host-side so
    # the kernel needs no vector integer division.
    jmod = (jnp.arange(hw, dtype=jnp.int32) % w).reshape(1, hw)

    isz = x.dtype.itemsize
    n_taps = kh * kw
    # Per-plane working set: double-buffered in/out blocks, flat padded
    # scratch, plus ~n_taps live sort temporaries (spill headroom) and masks.
    per_plane_ws = isz * (4 * hw + L + (n_taps + 2) * hw) + (kw + 4) * hw
    tb = _choose_plane_block(bc, per_plane_ws)
    vmem_limit = int(min(max(2 * tb * per_plane_ws, 32 << 20), 48 << 20))

    kern = functools.partial(_median_kernel, kh=kh, kw=kw, ph=ph, pw=pw,
                             h=h, w=w, base=base)

    out_flat = pl.pallas_call(
        kern,
        out_shape=jax.ShapeDtypeStruct((bc, hw), x.dtype),
        grid_spec=pltpu.PrefetchScalarGridSpec(
            num_scalar_prefetch=0,
            grid=(bc // tb,),
            in_specs=[pl.BlockSpec((1, hw), lambda i: (0, 0)),
                      pl.BlockSpec((tb, hw), lambda i: (i, 0))],
            out_specs=pl.BlockSpec((tb, hw), lambda i: (i, 0)),
            scratch_shapes=[pltpu.VMEM((tb, L), x.dtype)],
        ),
        compiler_params=pltpu.CompilerParams(
            dimension_semantics=("parallel",),
            vmem_limit_bytes=vmem_limit,
        ),
    )(jmod, xf)

    out = out_flat.reshape(b, c, h, w)
    if out_h != h or out_w != w:        # only for even kernel sizes
        out = out[:, :, :out_h, :out_w]
    return out


def _median_blur_ref(x, kernel_size=(3, 3)):
    """Pure-JAX reference (same semantics as the PyTorch module)."""
    kh, kw = kernel_size
    ph, pw = _compute_zero_padding(kernel_size)
    h, w = x.shape[-2:]
    out_h = h + 2 * ph - kh + 1
    out_w = w + 2 * pw - kw + 1
    xp = jnp.pad(x, ((0, 0), (0, 0), (ph, ph), (pw, pw)))
    windows = jnp.stack(
        [xp[:, :, di:di + out_h, dj:dj + out_w]
         for di in range(kh) for dj in range(kw)],
        axis=2,
    )
    n = kh * kw
    return jnp.sort(windows, axis=2)[:, :, (n - 1) // 2]


if __name__ == "__main__":
    # NOTE: NaN handling differs from torch (min/max propagate NaN; torch.sort
    # orders NaNs last) -- only relevant for NaN-containing inputs.
    key = jax.random.PRNGKey(0)

    # Primary case: 3x3 median (19-exchange network path), (2, 4, 16, 16).
    x = jax.random.uniform(key, (2, 4, 16, 16), dtype=jnp.float32)
    out = jax.block_until_ready(median_blur(x, kernel_size=(3, 3)))
    ref = _median_blur_ref(x, kernel_size=(3, 3))
    assert out.shape == (2, 4, 16, 16)
    assert jnp.allclose(out, ref, atol=1e-6, rtol=0)

    # Secondary case: general selection network + odd plane count.
    x2 = jax.random.uniform(jax.random.PRNGKey(1), (1, 3, 20, 24),
                            dtype=jnp.float32)
    out2 = jax.block_until_ready(median_blur(x2, kernel_size=(5, 5)))
    ref2 = _median_blur_ref(x2, kernel_size=(5, 5))
    assert out2.shape == (1, 3, 20, 24)
    assert jnp.allclose(out2, ref2, atol=1e-6, rtol=0)

    print("KERNEL_OK")
</pallas_src>

<mosaic_0001>
module attributes {stable_mosaic.version = 11 : i64} {
  func.func @_median_kernel(%arg0: i32, %arg1: memref<1x256xi32, #tpu.memory_space<vmem>>, %arg2: memref<8x256xf32, #tpu.memory_space<vmem>>, %arg3: memref<8x256xf32, #tpu.memory_space<vmem>>, %arg4: memref<8x401xf32, #tpu.memory_space<vmem>>) attributes {dimension_semantics = [#tpu.dimension_semantics<parallel>], iteration_bounds = array<i64: 1>, scalar_prefetch = 0 : i64, scratch_operands = 1 : i64, tpu.core_type = #tpu.core_type<tc>, window_params = [{pipeline_mode = #tpu.pipeline_mode<synchronous>, transform_indices = @transform_0, window_bounds = array<i64: 1, 256>}, {transform_indices = @transform_1, window_bounds = array<i64: 8, 256>}, {transform_indices = @transform_2, window_bounds = array<i64: 8, 256>}]} {
    %cst = arith.constant 0.000000e+00 : f32
    %0 = vector.broadcast %cst : f32 to vector<8x128xf32>
    %c0 = arith.constant 0 : index
    %c0_0 = arith.constant 0 : index
    %1 = vector.load %arg4[%c0, %c0_0] : memref<8x401xf32, #tpu.memory_space<vmem>>, vector<8x128xf32>
    tpu.vector_store %arg4[%c0, %c0_0], %0 {strides = array<i32>} : memref<8x401xf32, #tpu.memory_space<vmem>>, vector<8x128xf32>,
    %cst_1 = arith.constant 0.000000e+00 : f32
    %2 = vector.broadcast %cst_1 : f32 to vector<8x17xf32>
    %c0_2 = arith.constant 0 : index
    %c384 = arith.constant 384 : index
    %3 = vector.load %arg4[%c0_2, %c384] : memref<8x401xf32, #tpu.memory_space<vmem>>, vector<8x17xf32>
    tpu.vector_store %arg4[%c0_2, %c384], %2 {strides = array<i32>} : memref<8x401xf32, #tpu.memory_space<vmem>>, vector<8x17xf32>,
    %c0_3 = arith.constant 0 : index
    %c0_4 = arith.constant 0 : index
    %4 = vector.load %arg2[%c0_3, %c0_4] : memref<8x256xf32, #tpu.memory_space<vmem>>, vector<8x256xf32>
    %c0_5 = arith.constant 0 : index
    %c128 = arith.constant 128 : index
    %5 = vector.load %arg4[%c0_5, %c128] : memref<8x401xf32, #tpu.memory_space<vmem>>, vector<8x256xf32>
    tpu.vector_store %arg4[%c0_5, %c128], %4 {strides = array<i32>} : memref<8x401xf32, #tpu.memory_space<vmem>>, vector<8x256xf32>,
    %c0_6 = arith.constant 0 : index
    %c0_7 = arith.constant 0 : index
    %6 = vector.load %arg1[%c0_6, %c0_7] : memref<1x256xi32, #tpu.memory_space<vmem>>, vector<1x256xi32>
    %c1_i32 = arith.constant 1 : i32
    %7 = vector.broadcast %c1_i32 : i32 to vector<1x256xi32>
    %8 = arith.cmpi sge, %6, %7 : vector<1x256xi32>
    %c15_i32 = arith.constant 15 : i32
    %9 = vector.broadcast %c15_i32 : i32 to vector<1x256xi32>
    %10 = arith.cmpi slt, %6, %9 : vector<1x256xi32>
    %c0_8 = arith.constant 0 : index
    %c111 = arith.constant 111 : index
    %11 = vector.load %arg4[%c0_8, %c111] : memref<8x401xf32, #tpu.memory_space<vmem>>, vector<8x256xf32>
    %cst_9 = arith.constant 0.000000e+00 : f32
    %12 = vector.shape_cast %8 : vector<1x256xi1> to vector<1x256xi1>
    %13 = vector.broadcast %12 : vector<1x256xi1> to vector<8x256xi1>
    %14 = vector.broadcast %cst_9 : f32 to vector<8x256xf32>
    %15 = arith.select %13, %11, %14 : vector<8x256xi1>, vector<8x256xf32>
    %c0_10 = arith.constant 0 : index
    %c112 = arith.constant 112 : index
    %16 = vector.load %arg4[%c0_10, %c112] : memref<8x401xf32, #tpu.memory_space<vmem>>, vector<8x256xf32>
    %c0_11 = arith.constant 0 : index
    %c113 = arith.constant 113 : index
    %17 = vector.load %arg4[%c0_11, %c113] : memref<8x401xf32, #tpu.memory_space<vmem>>, vector<8x256xf32>
    %cst_12 = arith.constant 0.000000e+00 : f32
    %18 = vector.shape_cast %10 : vector<1x256xi1> to vector<1x256xi1>
    %19 = vector.broadcast %18 : vector<1x256xi1> to vector<8x256xi1>
    %20 = vector.broadcast %cst_12 : f32 to vector<8x256xf32>
    %21 = arith.select %19, %17, %20 : vector<8x256xi1>, vector<8x256xf32>
    %c0_13 = arith.constant 0 : index
    %c127 = arith.constant 127 : index
    %22 = vector.load %arg4[%c0_13, %c127] : memref<8x401xf32, #tpu.memory_space<vmem>>, vector<8x256xf32>
    %cst_14 = arith.constant 0.000000e+00 : f32
    %23 = vector.shape_cast %8 : vector<1x256xi1> to vector<1x256xi1>
    %24 = vector.broadcast %23 : vector<1x256xi1> to vector<8x256xi1>
    %25 = vector.broadcast %cst_14 : f32 to vector<8x256xf32>
    %26 = arith.select %24, %22, %25 : vector<8x256xi1>, vector<8x256xf32>
    %c0_15 = arith.constant 0 : index
    %c128_16 = arith.constant 128 : index
    %27 = vector.load %arg4[%c0_15, %c128_16] : memref<8x401xf32, #tpu.memory_space<vmem>>, vector<8x256xf32>
    %c0_17 = arith.constant 0 : index
    %c129 = arith.constant 129 : index
    %28 = vector.load %arg4[%c0_17, %c129] : memref<8x401xf32, #tpu.memory_space<vmem>>, vector<8x256xf32>
    %cst_18 = arith.constant 0.000000e+00 : f32
    %29 = vector.shape_cast %10 : vector<1x256xi1> to vector<1x256xi1>
    %30 = vector.broadcast %29 : vector<1x256xi1> to vector<8x256xi1>
    %31 = vector.broadcast %cst_18 : f32 to vector<8x256xf32>
    %32 = arith.select %30, %28, %31 : vector<8x256xi1>, vector<8x256xf32>
    %c0_19 = arith.constant 0 : index
    %c143 = arith.constant 143 : index
    %33 = vector.load %arg4[%c0_19, %c143] : memref<8x401xf32, #tpu.memory_space<vmem>>, vector<8x256xf32>
    %cst_20 = arith.constant 0.000000e+00 : f32
    %34 = vector.shape_cast %8 : vector<1x256xi1> to vector<1x256xi1>
    %35 = vector.broadcast %34 : vector<1x256xi1> to vector<8x256xi1>
    %36 = vector.broadcast %cst_20 : f32 to vector<8x256xf32>
    %37 = arith.select %35, %33, %36 : vector<8x256xi1>, vector<8x256xf32>
    %c0_21 = arith.constant 0 : index
    %c144 = arith.constant 144 : index
    %38 = vector.load %arg4[%c0_21, %c144] : memref<8x401xf32, #tpu.memory_space<vmem>>, vector<8x256xf32>
    %c0_22 = arith.constant 0 : index
    %c145 = arith.constant 145 : index
    %39 = vector.load %arg4[%c0_22, %c145] : memref<8x401xf32, #tpu.memory_space<vmem>>, vector<8x256xf32>
    %cst_23 = arith.constant 0.000000e+00 : f32
    %40 = vector.shape_cast %10 : vector<1x256xi1> to vector<1x256xi1>
    %41 = vector.broadcast %40 : vector<1x256xi1> to vector<8x256xi1>
    %42 = vector.broadcast %cst_23 : f32 to vector<8x256xf32>
    %43 = arith.select %41, %39, %42 : vector<8x256xi1>, vector<8x256xf32>
    %44 = arith.minimumf %16, %21 : vector<8x256xf32>
    %45 = arith.maximumf %16, %21 : vector<8x256xf32>
    %46 = arith.minimumf %27, %32 : vector<8x256xf32>
    %47 = arith.maximumf %27, %32 : vector<8x256xf32>
    %48 = arith.minimumf %38, %43 : vector<8x256xf32>
    %49 = arith.maximumf %38, %43 : vector<8x256xf32>
    %50 = arith.minimumf %15, %44 : vector<8x256xf32>
    %51 = arith.maximumf %15, %44 : vector<8x256xf32>
    %52 = arith.minimumf %26, %46 : vector<8x256xf32>
    %53 = arith.maximumf %26, %46 : vector<8x256xf32>
    %54 = arith.minimumf %37, %48 : vector<8x256xf32>
    %55 = arith.maximumf %37, %48 : vector<8x256xf32>
    %56 = arith.minimumf %51, %45 : vector<8x256xf32>
    %57 = arith.maximumf %51, %45 : vector<8x256xf32>
    %58 = arith.minimumf %53, %47 : vector<8x256xf32>
    %59 = arith.maximumf %53, %47 : vector<8x256xf32>
    %60 = arith.minimumf %55, %49 : vector<8x256xf32>
    %61 = arith.maximumf %55, %49 : vector<8x256xf32>
    %62 = arith.maximumf %50, %52 : vector<8x256xf32>
    %63 = arith.minimumf %59, %61 : vector<8x256xf32>
    %64 = arith.minimumf %58, %60 : vector<8x256xf32>
    %65 = arith.maximumf %58, %60 : vector<8x256xf32>
    %66 = arith.maximumf %62, %54 : vector<8x256xf32>
    %67 = arith.maximumf %56, %64 : vector<8x256xf32>
    %68 = arith.minimumf %57, %63 : vector<8x256xf32>
    %69 = arith.minimumf %67, %65 : vector<8x256xf32>
    %70 = arith.minimumf %69, %68 : vector<8x256xf32>
    %71 = arith.maximumf %69, %68 : vector<8x256xf32>
    %72 = arith.maximumf %66, %70 : vector<8x256xf32>
    %73 = arith.minimumf %72, %71 : vector<8x256xf32>
    %c0_24 = arith.constant 0 : index
    %c0_25 = arith.constant 0 : index
    %74 = vector.load %arg3[%c0_24, %c0_25] : memref<8x256xf32, #tpu.memory_space<vmem>>, vector<8x256xf32>
    tpu.vector_store %arg3[%c0_24, %c0_25], %73 {strides = array<i32>} : memref<8x256xf32, #tpu.memory_space<vmem>>, vector<8x256xf32>,
    return
  }
  func.func @transform_0(%arg0: i32) -> (i32, i32) {
    %c0_i32 = arith.constant 0 : i32
    %c0_i32_0 = arith.constant 0 : i32
    %c0_i32_1 = arith.constant 0 : i32
    return %c0_i32, %c0_i32_0 : i32, i32
  }
  func.func @transform_1(%arg0: i32) -> (i32, i32) {
    %c0_i32 = arith.constant 0 : i32
    %c0_i32_0 = arith.constant 0 : i32
    return %arg0, %c0_i32 : i32, i32
  }
  func.func @transform_2(%arg0: i32) -> (i32, i32) {
    %c0_i32 = arith.constant 0 : i32
    %c0_i32_0 = arith.constant 0 : i32
    return %arg0, %c0_i32 : i32, i32
  }
}

</mosaic_0001>

<bundles_post_ra>
// kernel: tpu_custom_call.1
= control target key start
LH: loop header
LB: loop body
LE: loop exit
PB: predicated region body
PF: predicated region fallthrough
CT: control target
= control target key end

     0   :  { %7 = vsyncpa [#allocation4], 0  ;;  %s531_s0 = inlined_call_operand.hbm [shape: s32[1,256], index: 0, kind: input, shape index: {}]   ;;  %s532_s1 = inlined_call_operand.hbm [shape: f32[8,256], index: 1, kind: input, shape index: {}]   ;;  %s533_s2 = inlined_call_operand.hbm [shape: f32[8,256], index: 2, kind: output, shape index: {}]  }
   0x1   :  { %8 = vsyncpa [#allocation7], 0 }
   0x2   :  { %9 = vsyncpa [#allocation5], 0  ;;  %s388_s9 = smov [#allocation3]   ;;  %s389_s11 = smov [#allocation6]  }
   0x3   :  { %s16_s10 = sshll.u32 %s388_s9, 4  ;;  %s26_s12 = sshll.u32 %s389_s11, 4  ;;  %s17_s10 = int_to_ptr.vmem [resolvable:$true] %s16_s10  ;;  %s27_s12 = int_to_ptr.vmem [resolvable:$true] %s26_s12 }
   0x4   :  { %s330_s13 = scalar_lea.vmem %s17_s10, 32  ;;  %p335_p1 = scmp.lt.s32.totalorder %s17_s10, %s17_s10 }
   0x5   :  { %p331_p0 = scmp.ne.s32.totalorder %s17_s10, %s330_s13  ;;  %p336_p2 = scmp.lt.s32.totalorder %s330_s13, %s330_s13 }
   0x7   :  { %p337_p3 = por %p336_p2, %p335_p1 }
   0x9   :  { %p338_p4 = pnand %p337_p3, %p331_p0 }
   0xb   :  { %341 = shalt.err (!%p338_p4)
}
   0xc   :  { %19 = dma.hbm_to_vmem [thread:$0]  %s531_s0, 32, %s17_s10, [#allocation4]  }
   0xd   :  { %s350_s16 = scalar_lea.vmem %s27_s12, 256  ;;  %p355_p6 = scmp.lt.s32.totalorder %s27_s12, %s27_s12 }
   0xe   :  { %p351_p5 = scmp.ne.s32.totalorder %s27_s12, %s350_s16  ;;  %p356_p7 = scmp.lt.s32.totalorder %s350_s16, %s350_s16 }
  0x10   :  { %p357_p8 = por %p356_p7, %p355_p6 }
  0x12   :  { %p358_p9 = pnand %p357_p8, %p351_p5 }
  0x14   :  { %361 = shalt.err (!%p358_p9)
}
  0x15   :  { %29 = dma.hbm_to_vmem [thread:$0]  %s532_s1, 256, %s27_s12, [#allocation7]  }
  0x16   :  { %382 = dma.done.wait [#allocation4], 32  }
  0x17   :  { %383 = vsyncadd [#allocation4], 4294967264 }
  0x18   :  { %384 = dma.done.wait [#allocation7], 256  }
  0x19   :  { %385 = vsyncadd [#allocation7], 4294967040  ;;  %vm37_vm0 = vcmask 138240   ;;  %v390_v0 = vmov 0.0   ;;  %v423_v1 = vld [vmem:[#allocation6] sm:$0xff]  ;;  %v425_v2 = vld [vmem:[#allocation6 + $0x8] sm:$0xff]  ;;  %v50_v4 = vlaneseq }
  0x1a   :  { %38 = vst.msk [vmem:[#allocation2 + $0x18] sm:$0xff] %vm37_vm0, %v390_v0  ;;  %s391_s0 = smov 111   ;;  %s392_s1 = smov 15   ;;  %v434_v5 = vld [vmem:[#allocation3] sm:$0x3]  ;;  %v393_v9 = vmov 0  }
  0x1b   :  { %140 = vrot.lane.b32.xlu0 %v423_v1, %s391_s0  ;;  %v436_v6 = vshrl.u32 %v50_v4, 7  ;;  %vm45_vm1 = vcmp.lt.s32.totalorder %v434_v5, 15  ;;  %vm146_vm2 = vcmask 908288   ;;  %vm92_vm5 = vcmask 121856   ;;  %s394_s19 = smov 16   ;;  %s395_s20 = smov 112  }
  0x1c   :  { %v75_v10 = vsel %vm45_vm1, 1, %v393_v9  ;;  %s396_s21 = smov 127   ;;  %s397_s22 = smov 1   ;;  %vm180_vm6 = vcmask 130048   ;;  %vm159_vm7 = vcmask 916480   ;;  %vm44_vm8 = vcmp.ge.s32.totalorder %v434_v5, 1 }
  0x1d   :  { %v52_v7 = vsub.s32 0, %v436_v6  ;;  %v56_v8 = vsub.s32 1, %v436_v6  ;;  %s398_s23 = smov 113   ;;  %s399_s24 = smov 17   ;;  %vm120_vm9 = vcmask 1039360   ;;  %v49_v59 = vsel %vm44_vm8, 1, %v393_v9 }
  0x1e   :  { %vm105_vm10 = vcmask 7168   ;;  %vm133_vm13 = vcmask 924672   ;;  %s400_s25 = smov [#allocation8]  }
  0x1f   :  { %142 = vrot.lane.b32.xlu0 %v425_v2, %s391_s0  ;;  %v444_v11 = vrot.slane %v75_v10, %v52_v7  ;;  %v448_v12 = vrot.slane %v75_v10, %v56_v8  ;;  %v53_v61 = vrot.slane %v49_v59, %v52_v7  ;;  %v57_v5 = vrot.slane %v49_v59, %v56_v8  ;;  %s299_s26 = sshll.u32 %s400_s25, 4  ;;  %s300_s26 = int_to_ptr.vmem [resolvable:$true] %s299_s26 }
  0x20   :  { %s362_s27 = scalar_lea.vmem %s300_s26, 256  ;;  %p367_p11 = scmp.lt.s32.totalorder %s300_s26, %s300_s26 }
  0x21   :  { %v428_v3 = vld [vmem:[#allocation2 + $0x18] sm:$0xff]  ;;  %vm84_vm3 = vcmp.eq.s32.totalorder %v444_v11, 1  ;;  %vm85_vm4 = vcmp.eq.s32.totalorder %v448_v12, 1  ;;  %vm58_vm11 = vcmp.eq.s32.totalorder %v53_v61, 1  ;;  %vm59_vm12 = vcmp.eq.s32.totalorder %v57_v5, 1  ;;  %p363_p10 = scmp.ne.s32.totalorder %s300_s26, %s362_s27  ;;  %p368_p12 = scmp.lt.s32.totalorder %s362_s27, %s362_s27 }
  0x22   :  { %144 = vrot.lane.b32.xlu1 %v428_v3, %s391_s0 }
  0x23   :  { %88 = vrot.lane.b32.xlu0 %v423_v1, %s392_s1  ;;  %p369_p13 = por %p368_p12, %p367_p11 }
  0x25   :  { %p370_p0 = pnand %p369_p13, %p363_p10 }
  0x26   :  { %86 = vrot.lane.b32.xlu1 %v390_v0, %s392_s1 }
  0x2a   :  { %90 = vrot.lane.b32.xlu1 %v425_v2, %s392_s1 }
  0x8d   :  { %v141_v13 = vpop.permute.xlu0 %140 }
  0x91   :  { %v143_v15 = vpop.permute.xlu0 %142 }
  0x92   :  { %v147_v16 = vsel %vm146_vm2, %v141_v13, %v143_v15 }
  0x93   :  { %v151_v19 = vsel %vm84_vm3, %v147_v16, 0.0 }
  0x94   :  { %v145_v14 = vpop.permute.xlu1 %144  ;;  %176 = vrot.lane.b32.xlu0 %v151_v19, %s394_s19 }
  0x95   :  { %v148_v17 = vsel %vm146_vm2, %v143_v15, %v145_v14  ;;  %v89_v21 = vpop.permute.xlu0 %88 }
  0x96   :  { %v152_v20 = vsel %vm85_vm4, %v148_v17, 0.0 }
  0x97   :  { %178 = vrot.lane.b32.xlu1 %v152_v20, %s394_s19 }
  0x98   :  { %v87_v18 = vpop.permute.xlu1 %86 }
  0x99   :  { %v93_v22 = vsel %vm92_vm5, %v87_v18, %v89_v21 }
  0x9a   :  { %v97_v25 = vsel %vm84_vm3, %v93_v22, 0.0 }
  0x9b   :  { %155 = vrot.lane.b32.xlu0 %v97_v25, %s395_s20 }
  0x9c   :  { %v91_v23 = vpop.permute.xlu1 %90 }
  0x9d   :  { %v94_v24 = vsel %vm92_vm5, %v89_v21, %v91_v23 }
  0x9e   :  { %v98_v26 = vsel %vm85_vm4, %v94_v24, 0.0 }
  0x9f   :  { %157 = vrot.lane.b32.xlu1 %v98_v26, %s395_s20  ;;  %114 = vrot.lane.b32.xlu0 %v423_v1, %s396_s21 }
  0xa3   :  { %116 = vrot.lane.b32.xlu1 %v425_v2, %s396_s21  ;;  %118 = vrot.lane.b32.xlu0 %v428_v3, %s396_s21 }
  0xa7   :  { %99 = vrot.lane.b32.xlu1 %v390_v0, %s397_s22  ;;  %101 = vrot.lane.b32.xlu0 %v423_v1, %s397_s22 }
  0xab   :  { %103 = vrot.lane.b32.xlu1 %v425_v2, %s397_s22  ;;  %127 = vrot.lane.b32.xlu0 %v423_v1, %s398_s23 }
  0xaf   :  { %129 = vrot.lane.b32.xlu1 %v425_v2, %s398_s23  ;;  %131 = vrot.lane.b32.xlu0 %v428_v3, %s398_s23 }
  0xb3   :  { %65 = vrot.lane.b32.xlu1 %v423_v1, %s399_s24  ;;  %63 = vrot.lane.b32.xlu0 %v390_v0, %s399_s24 }
  0xb7   :  { %67 = vrot.lane.b32.xlu0 %v425_v2, %s399_s24 }
 0x106   :  { %v177_v27 = vpop.permute.xlu0 %176 }
 0x107   :  { %v185_v28 = vmin.f32 %v423_v1, %v177_v27  ;;  %v188_v29 = vmax.f32 %v423_v1, %v177_v27 }
 0x109   :  { %v179_v30 = vpop.permute.xlu1 %178  ;;  %253 = vrot.lane.b32.xlu0 %v188_v29, %s395_s20  ;;  %215 = vrot.lane.b32.xlu1 %v185_v28, %s395_s20 }
 0x10a   :  { %v187_v32 = vmin.f32 %v428_v3, %v179_v30  ;;  %v190_v33 = vmax.f32 %v428_v3, %v179_v30  ;;  %v181_v34 = vsel %vm180_vm6, %v177_v27, %v179_v30 }
 0x10b   :  { %v186_v37 = vmin.f32 %v425_v2, %v181_v34  ;;  %v189_v43 = vmax.f32 %v425_v2, %v181_v34 }
 0x10d   :  { %v156_v31 = vpop.permute.xlu0 %155  ;;  %257 = vrot.lane.b32.xlu0 %v190_v33, %s395_s20  ;;  %219 = vrot.lane.b32.xlu1 %v187_v32, %s395_s20 }
 0x10e   :  { %v164_v35 = vmin.f32 %v156_v31, 0.0  ;;  %v167_v41 = vmax.f32 %v156_v31, 0.0 }
 0x111   :  { %v158_v36 = vpop.permute.xlu1 %157  ;;  %194 = vrot.lane.b32.xlu1 %v164_v35, %s394_s19  ;;  %217 = vrot.lane.b32.xlu0 %v186_v37, %s395_s20  ;;  %v115_v45 = vpop.permute.xlu0 %114 }
 0x112   :  { %v160_v38 = vsel %vm159_vm7, %v156_v31, %v158_v36  ;;  %v166_v39 = vmin.f32 %v425_v2, %v158_v36  ;;  %v169_v44 = vmax.f32 %v425_v2, %v158_v36 }
 0x113   :  { %v165_v40 = vmin.f32 %v423_v1, %v160_v38  ;;  %v168_v42 = vmax.f32 %v423_v1, %v160_v38 }
 0x115   :  { %198 = vrot.lane.b32.xlu1 %v166_v39, %s394_s19  ;;  %196 = vrot.lane.b32.xlu0 %v165_v40, %s394_s19  ;;  %v119_v46 = vpop.permute.xlu0 %118  ;;  %v117_v48 = vpop.permute.xlu1 %116 }
 0x116   :  { %v121_v60 = vsel %vm120_vm9, %v115_v45, %v117_v48  ;;  %v122_v3 = vsel %vm120_vm9, %v117_v48, %v119_v46 }
 0x117   :  { %v125_v0 = vsel %vm84_vm3, %v121_v60, 0.0  ;;  %v126_v14 = vsel %vm85_vm4, %v122_v3, 0.0 }
 0x118   :  { %v170_v9 = vmin.f32 %v423_v1, %v125_v0  ;;  %v172_v17 = vmax.f32 %v423_v1, %v125_v0  ;;  %v171_v18 = vmin.f32 %v425_v2, %v126_v14  ;;  %v173_v19 = vmax.f32 %v425_v2, %v126_v14 }
 0x119   :  { %232 = vrot.lane.b32.xlu1 %v167_v41, %s394_s19  ;;  %234 = vrot.lane.b32.xlu0 %v168_v42, %s394_s19  ;;  %v102_v47 = vpop.permute.xlu0 %101  ;;  %v100_v50 = vpop.permute.xlu1 %99 }
 0x11a   :  { %v106_v4 = vsel %vm105_vm10, %v100_v50, %v102_v47 }
 0x11b   :  { %v110_v7 = vsel %vm58_vm11, %v106_v4, 0.0 }
 0x11c   :  { %v210_v6 = vmax.f32 %v110_v7, %v170_v9  ;;  %v208_v23 = vmin.f32 %v110_v7, %v170_v9 }
 0x11d   :  { %255 = vrot.lane.b32.xlu1 %v189_v43, %s395_s20  ;;  %v128_v49 = vpop.permute.xlu0 %127  ;;  %v104_v52 = vpop.permute.xlu1 %103 }
 0x11e   :  { %v107_v15 = vsel %vm105_vm10, %v102_v47, %v104_v52  ;;  %v246_v1 = vmin.f32 %v210_v6, %v172_v17  ;;  %v248_v31 = vmax.f32 %v210_v6, %v172_v17 }
 0x11f   :  { %v111_v8 = vsel %vm59_vm12, %v107_v15, 0.0 }
 0x120   :  { %v209_v27 = vmin.f32 %v111_v8, %v171_v18  ;;  %v211_v28 = vmax.f32 %v111_v8, %v171_v18 }
 0x121   :  { %236 = vrot.lane.b32.xlu1 %v169_v44, %s394_s19  ;;  %v132_v51 = vpop.permute.xlu0 %131  ;;  %v130_v54 = vpop.permute.xlu1 %129 }
 0x122   :  { %v134_v20 = vsel %vm133_vm13, %v128_v49, %v130_v54  ;;  %v135_v21 = vsel %vm133_vm13, %v130_v54, %v132_v51  ;;  %v247_v47 = vmin.f32 %v211_v28, %v173_v19  ;;  %v249_v48 = vmax.f32 %v211_v28, %v173_v19 }
 0x123   :  { %v138_v2 = vsel %vm58_vm11, %v134_v20, 0.0  ;;  %v139_v32 = vsel %vm59_vm12, %v135_v21, 0.0 }
 0x125   :  { %v64_v53 = vpop.permute.xlu0 %63  ;;  %v66_v56 = vpop.permute.xlu1 %65 }
 0x126   :  { %v69_v12 = vsel %vm37_vm0, %v64_v53, %v66_v56 }
 0x127   :  { %v73_v33 = vsel %vm58_vm11, %v69_v12, 0.0 }
 0x129   :  { %v68_v55 = vpop.permute.xlu0 %67 }
 0x12a   :  { %v70_v24 = vsel %vm37_vm0, %v66_v56, %v68_v55 }
 0x12b   :  { %v74_v34 = vsel %vm59_vm12, %v70_v24, 0.0 }
 0x17b   :  { %v254_v57 = vpop.permute.xlu0 %253  ;;  %v216_v58 = vpop.permute.xlu1 %215 }
 0x17f   :  { %v258_v62 = vpop.permute.xlu0 %257  ;;  %v220_v63 = vpop.permute.xlu1 %219 }
 0x183   :  { %v218_v10 = vpop.permute.xlu0 %217  ;;  %v195_v13 = vpop.permute.xlu1 %194 }
 0x184   :  { %v221_v25 = vsel %vm159_vm7, %v216_v58, %v218_v10  ;;  %v222_v26 = vsel %vm159_vm7, %v218_v10, %v220_v63 }
 0x185   :  { %v227_v35 = vmax.f32 %v138_v2, %v221_v25  ;;  %v228_v36 = vmax.f32 %v139_v32, %v222_v26  ;;  %v225_v0 = vmin.f32 %v138_v2, %v221_v25  ;;  %v226_v14 = vmin.f32 %v139_v32, %v222_v26 }
 0x187   :  { %v197_v16 = vpop.permute.xlu0 %196  ;;  %v199_v11 = vpop.permute.xlu1 %198 }
 0x188   :  { %v200_v29 = vsel %vm180_vm6, %v195_v13, %v197_v16  ;;  %v201_v37 = vsel %vm180_vm6, %v197_v16, %v199_v11 }
 0x189   :  { %v204_v39 = vmin.f32 %v73_v33, %v200_v29  ;;  %v206_v43 = vmax.f32 %v73_v33, %v200_v29  ;;  %v205_v49 = vmin.f32 %v74_v34, %v201_v37  ;;  %v207_v51 = vmax.f32 %v74_v34, %v201_v37 }
 0x18b   :  { %v233_v22 = vpop.permute.xlu1 %232  ;;  %v235_v30 = vpop.permute.xlu0 %234  ;;  %v267_v56 = vmax.f32 %v204_v39, %v208_v23  ;;  %v268_v3 = vmax.f32 %v205_v49, %v209_v27 }
 0x18c   :  { %v238_v40 = vsel %vm180_vm6, %v233_v22, %v235_v30 }
 0x18d   :  { %v242_v52 = vmin.f32 %v206_v43, %v238_v40  ;;  %v244_v58 = vmax.f32 %v206_v43, %v238_v40  ;;  %v275_v7 = vmax.f32 %v267_v56, %v225_v0  ;;  %v276_v17 = vmax.f32 %v268_v3, %v226_v14 }
 0x18f   :  { %v256_v38 = vpop.permute.xlu1 %255 }
 0x190   :  { %v259_v41 = vsel %vm159_vm7, %v254_v57, %v256_v38  ;;  %v260_v42 = vsel %vm159_vm7, %v256_v38, %v258_v62 }
 0x191   :  { %v263_v44 = vmin.f32 %v227_v35, %v259_v41  ;;  %v264_v45 = vmin.f32 %v228_v36, %v260_v42  ;;  %v265_v46 = vmax.f32 %v227_v35, %v259_v41  ;;  %v266_v50 = vmax.f32 %v228_v36, %v260_v42 }
 0x193   :  { %v269_v53 = vmin.f32 %v248_v31, %v265_v46  ;;  %v271_v54 = vmin.f32 %v246_v1, %v263_v44  ;;  %v237_v55 = vpop.permute.xlu1 %236  ;;  %v272_v59 = vmin.f32 %v247_v47, %v264_v45  ;;  %v273_v60 = vmax.f32 %v246_v1, %v263_v44 }
 0x194   :  { %v239_v57 = vsel %vm180_vm6, %v235_v30, %v237_v55  ;;  %v270_v4 = vmin.f32 %v249_v48, %v266_v50  ;;  %v274_v5 = vmax.f32 %v247_v47, %v264_v45 }
 0x195   :  { %v277_v61 = vmax.f32 %v242_v52, %v271_v54  ;;  %v243_v62 = vmin.f32 %v207_v51, %v239_v57  ;;  %v245_v63 = vmax.f32 %v207_v51, %v239_v57  ;;  %v279_v10 = vmin.f32 %v244_v58, %v269_v53 }
 0x197   :  { %v281_v13 = vmin.f32 %v277_v61, %v273_v60  ;;  %v278_v9 = vmax.f32 %v243_v62, %v272_v59  ;;  %v280_v16 = vmin.f32 %v245_v63, %v270_v4 }
 0x199   :  { %v283_v15 = vmin.f32 %v281_v13, %v279_v10  ;;  %v282_v11 = vmin.f32 %v278_v9, %v274_v5  ;;  %v285_v6 = vmax.f32 %v281_v13, %v279_v10 }
 0x19b   :  { %v284_v18 = vmin.f32 %v282_v11, %v280_v16  ;;  %v287_v8 = vmax.f32 %v275_v7, %v283_v15  ;;  %v286_v19 = vmax.f32 %v282_v11, %v280_v16 }
 0x19d   :  { %v288_v20 = vmax.f32 %v276_v17, %v284_v18  ;;  %v289_v21 = vmin.f32 %v287_v8, %v285_v6 }
 0x19f   :  { %v290_v12 = vmin.f32 %v288_v20, %v286_v19  ;;  %291 = vst [vmem:[#allocation8] sm:$0xff] %v289_v21 }
 0x1a1   :  { %292 = vst [vmem:[#allocation8 + $0x8] sm:$0xff] %v290_v12 }
 0x1a2   :  { %373 = shalt.err (!%p370_p0)
}
 0x1a3   :  { %302 = dma.vmem_to_hbm [thread:$0]  %s300_s26, 256, %s533_s2, [#allocation5]  }
 0x1a4   :  { %386 = dma.done.wait [#allocation5], 256  }
 0x1a5   :  { %387 = vsyncadd [#allocation5], 4294967040 }
 0x1a6   :  { %306 = vsyncpa [#allocation4], 1 }
 0x1a7   :  { %307 = vsyncpa [#allocation7], 1 }
 0x1a8   :  { %308 = vsyncpa [#allocation5], 1 }

</bundles_post_ra>
